<compile_context>
chip_gen: v7x
topology: tpu7x:2x2x1
jax: 0.10.0
libtpu: 0.0.40
codegen_flags: <defaults>
</compile_context>

<pallas_src>
import jax
import jax.numpy as jnp
from jax.experimental import pallas as pl
from jax.experimental.pallas import tpu as pltpu

_LANE = 128


def critic_kernel(state_ref, action_ref,
                  w1s_ref, w1a_ref, b1_ref,
                  w2_ref, b2_ref,
                  w3_ref, b3_ref,
                  out_ref):
    # Feature-major: all activations are [features, tb]; batch -> lanes.
    x_s = state_ref[...]           # [state_dim, tb]
    x_a = action_ref[...]          # [action_dim, tb]
    w1s = w1s_ref[...]             # [hidden, state_dim]
    w1a = w1a_ref[...]             # [hidden, action_dim]
    state_dim = x_s.shape[0]
    action_dim = x_a.shape[0]

    # ---- Layer 1 on the VPU: K = state_dim + action_dim (= 3) is degenerate
    # on a 128/256-wide MXU. h1[:, b] = sum_k w1[:, k] * x[k, b] unrolls into
    # sublane/lane-broadcast FMAs (outer products). This also fuses torch.cat
    # (separate state / action terms) and leaves the MXU free for layers 2/3.
    acc = w1s[:, 0:1] * x_s[0:1, :]                       # [hidden, tb]
    for k in range(1, state_dim):
        acc = acc + w1s[:, k:k + 1] * x_s[k:k + 1, :]
    for k in range(action_dim):
        acc = acc + w1a[:, k:k + 1] * x_a[k:k + 1, :]
    h1 = jnp.maximum(acc + b1_ref[...], 0.0)              # [hidden, tb]

    # ---- Layers 2/3 on the MXU: (M,K)x(K,N), K on sublanes, batch on lanes.
    h2 = jnp.dot(w2_ref[...], h1,
                 preferred_element_type=jnp.float32) + b2_ref[...]
    h2 = jnp.maximum(h2, 0.0)                             # [hidden, tb]

    q = jnp.dot(w3_ref[...], h2,
                preferred_element_type=jnp.float32) + b3_ref[...]
    out_ref[...] = q.astype(out_ref.dtype)                # [outputs, tb]


def _round_up(x, m):
    return ((x + m - 1) // m) * m


def critic_forward(state, action, params, *, batch_tile=2048, min_grid_steps=4):
    """state: [B, state_dim], action: [B, action_dim] -> q: [B, outputs]."""
    w1s, w1a, b1, w2, b2, w3, b3 = params
    B, state_dim = state.shape
    action_dim = action.shape[1]
    outputs = w3.shape[0]

    # Feature-major (lane-dense) inputs: [features, B]. Layout plumbing only.
    s_fm = state.T
    a_fm = action.T

    # Tile the batch (lane) axis; never a single unbounded block for large B.
    if B <= batch_tile:
        tb = max(_LANE, _round_up(B, _LANE))              # unmasked vst
        steps = 1
    else:
        steps = max(pl.cdiv(B, batch_tile), min_grid_steps)   # >=2 per TC (v7x)
        tb = max(_LANE, _round_up(pl.cdiv(B, steps), _LANE))
        steps = pl.cdiv(B, tb)                            # drop all-pad steps
    b_pad = tb * steps

    if b_pad != B:
        pad = ((0, 0), (0, b_pad - B))
        s_fm = jnp.pad(s_fm, pad)
        a_fm = jnp.pad(a_fm, pad)

    const = lambda shp: pl.BlockSpec(shp, lambda i: (0,) * len(shp))

    q_fm = pl.pallas_call(
        critic_kernel,
        out_shape=jax.ShapeDtypeStruct((outputs, b_pad), jnp.float32),
        grid=(steps,),
        in_specs=[
            pl.BlockSpec((state_dim, tb), lambda i: (0, i)),
            pl.BlockSpec((action_dim, tb), lambda i: (0, i)),
            const(w1s.shape), const(w1a.shape), const(b1.shape),
            const(w2.shape), const(b2.shape),
            const(w3.shape), const(b3.shape),
        ],
        out_specs=pl.BlockSpec((outputs, tb), lambda i: (0, i)),
        compiler_params=pltpu.CompilerParams(
            dimension_semantics=("parallel",)),   # v7x: split batch over 2 TCs
    )(s_fm, a_fm, w1s, w1a, b1, w2, b2, w3, b3)

    # [outputs, b_pad] -> [B, outputs]: strip lane padding, transpose back.
    return q_fm[:, :B].T


def init_critic_params(key, state_dim, action_dim, hidden, outputs):
    """PyTorch nn.Linear-style init (uniform +-1/sqrt(fan_in)).

    Weights are stored [out_features, in_features] (PyTorch layout); linear1's
    weight is split column-wise into a state block and an action block so that
    state @ W1s^T + action @ W1a^T == cat([state, action]) @ W1^T.
    Biases are stored [out_features, 1] (feature-major broadcast in-kernel).
    """
    ks = jax.random.split(key, 6)
    inputs = state_dim + action_dim

    def linear(kw, kb, fan_in, fan_out):
        bound = 1.0 / jnp.sqrt(jnp.float32(fan_in))
        w = jax.random.uniform(kw, (fan_out, fan_in), jnp.float32, -bound, bound)
        b = jax.random.uniform(kb, (fan_out, 1), jnp.float32, -bound, bound)
        return w, b

    w1, b1 = linear(ks[0], ks[1], inputs, hidden)
    w1s, w1a = w1[:, :state_dim], w1[:, state_dim:]
    w2, b2 = linear(ks[2], ks[3], hidden, hidden)
    w3, b3 = linear(ks[4], ks[5], hidden, outputs)
    return (w1s, w1a, b1, w2, b2, w3, b3)


if __name__ == "__main__":
    # MountainCarContinuous: state_dim=2, action_dim=1 -> inputs=3
    state_dim, action_dim = 2, 1
    hidden, outputs = 32, 1

    key = jax.random.PRNGKey(0)
    k_params, k_small, k_large = jax.random.split(key, 3)
    params = init_critic_params(k_params, state_dim, action_dim, hidden, outputs)
    w1s, w1a, b1, w2, b2, w3, b3 = params

    def reference(state, action):
        # Pure-JAX reference in the original (concat) formulation, high precision.
        x = jnp.concatenate([state, action], axis=1)
        w1 = jnp.concatenate([w1s, w1a], axis=1)
        hp = jax.lax.Precision.HIGHEST
        h = jnp.maximum(jnp.dot(x, w1.T, precision=hp) + b1.T, 0.0)
        h = jnp.maximum(jnp.dot(h, w2.T, precision=hp) + b2.T, 0.0)
        return jnp.dot(h, w3.T, precision=hp) + b3.T

    def run_and_check(k, batch):
        ks, ka = jax.random.split(k)
        state = jax.random.normal(ks, (batch, state_dim), jnp.float32)
        action = jax.random.normal(ka, (batch, action_dim), jnp.float32)
        q = critic_forward(state, action, params)
        jax.block_until_ready(q)
        ref = reference(state, action)
        assert q.shape == (batch, outputs), q.shape
        assert jnp.allclose(q, ref, atol=1e-4, rtol=1e-4), \
            f"mismatch vs reference (batch={batch})"

    run_and_check(k_small, 8)       # single-step path (lane-padded to 128)
    run_and_check(k_large, 2500)    # tiled path, non-multiple batch (padded last tile)
    print("KERNEL_OK")
</pallas_src>

<mosaic_0001>
module attributes {stable_mosaic.version = 11 : i64} {
  func.func @critic_kernel(%arg0: i32, %arg1: memref<2x128xf32, #tpu.memory_space<vmem>>, %arg2: memref<1x128xf32, #tpu.memory_space<vmem>>, %arg3: memref<32x2xf32, #tpu.memory_space<vmem>>, %arg4: memref<32x1xf32, #tpu.memory_space<vmem>>, %arg5: memref<32x1xf32, #tpu.memory_space<vmem>>, %arg6: memref<32x32xf32, #tpu.memory_space<vmem>>, %arg7: memref<32x1xf32, #tpu.memory_space<vmem>>, %arg8: memref<1x32xf32, #tpu.memory_space<vmem>>, %arg9: memref<1x1xf32, #tpu.memory_space<vmem>>, %arg10: memref<1x128xf32, #tpu.memory_space<vmem>>) attributes {dimension_semantics = [#tpu.dimension_semantics<parallel>], iteration_bounds = array<i64: 1>, scalar_prefetch = 0 : i64, scratch_operands = 0 : i64, tpu.core_type = #tpu.core_type<tc>, window_params = [{transform_indices = @transform_0, window_bounds = array<i64: 2, 128>}, {transform_indices = @transform_1, window_bounds = array<i64: 1, 128>}, {pipeline_mode = #tpu.pipeline_mode<synchronous>, transform_indices = @transform_2, window_bounds = array<i64: 32, 2>}, {pipeline_mode = #tpu.pipeline_mode<synchronous>, transform_indices = @transform_3, window_bounds = array<i64: 32, 1>}, {pipeline_mode = #tpu.pipeline_mode<synchronous>, transform_indices = @transform_4, window_bounds = array<i64: 32, 1>}, {pipeline_mode = #tpu.pipeline_mode<synchronous>, transform_indices = @transform_5, window_bounds = array<i64: 32, 32>}, {pipeline_mode = #tpu.pipeline_mode<synchronous>, transform_indices = @transform_6, window_bounds = array<i64: 32, 1>}, {pipeline_mode = #tpu.pipeline_mode<synchronous>, transform_indices = @transform_7, window_bounds = array<i64: 1, 32>}, {pipeline_mode = #tpu.pipeline_mode<synchronous>, transform_indices = @transform_8, window_bounds = array<i64: 1, 1>}, {transform_indices = @transform_9, window_bounds = array<i64: 1, 128>}]} {
    %c0 = arith.constant 0 : index
    %c0_0 = arith.constant 0 : index
    %0 = vector.load %arg1[%c0, %c0_0] : memref<2x128xf32, #tpu.memory_space<vmem>>, vector<2x128xf32>
    %c0_1 = arith.constant 0 : index
    %c0_2 = arith.constant 0 : index
    %1 = vector.load %arg2[%c0_1, %c0_2] : memref<1x128xf32, #tpu.memory_space<vmem>>, vector<1x128xf32>
    %c0_3 = arith.constant 0 : index
    %c0_4 = arith.constant 0 : index
    %2 = vector.load %arg3[%c0_3, %c0_4] : memref<32x2xf32, #tpu.memory_space<vmem>>, vector<32x2xf32>
    %c0_5 = arith.constant 0 : index
    %c0_6 = arith.constant 0 : index
    %3 = vector.load %arg4[%c0_5, %c0_6] : memref<32x1xf32, #tpu.memory_space<vmem>>, vector<32x1xf32>
    %4 = vector.extract_strided_slice %2 {offsets = [0, 0], sizes = [32, 1], strides = [1, 1]} : vector<32x2xf32> to vector<32x1xf32>
    %5 = vector.extract_strided_slice %0 {offsets = [0, 0], sizes = [1, 128], strides = [1, 1]} : vector<2x128xf32> to vector<1x128xf32>
    %6 = vector.broadcast %4 : vector<32x1xf32> to vector<32x128xf32>
    %7 = vector.broadcast %5 : vector<1x128xf32> to vector<32x128xf32>
    %8 = arith.mulf %6, %7 : vector<32x128xf32>
    %9 = vector.extract_strided_slice %2 {offsets = [0, 1], sizes = [32, 1], strides = [1, 1]} : vector<32x2xf32> to vector<32x1xf32>
    %10 = vector.extract_strided_slice %0 {offsets = [1, 0], sizes = [1, 128], strides = [1, 1]} : vector<2x128xf32> to vector<1x128xf32>
    %11 = vector.broadcast %9 : vector<32x1xf32> to vector<32x128xf32>
    %12 = vector.broadcast %10 : vector<1x128xf32> to vector<32x128xf32>
    %13 = arith.mulf %11, %12 : vector<32x128xf32>
    %14 = arith.addf %8, %13 : vector<32x128xf32>
    %15 = vector.broadcast %3 : vector<32x1xf32> to vector<32x128xf32>
    %16 = vector.broadcast %1 : vector<1x128xf32> to vector<32x128xf32>
    %17 = arith.mulf %15, %16 : vector<32x128xf32>
    %18 = arith.addf %14, %17 : vector<32x128xf32>
    %c0_7 = arith.constant 0 : index
    %c0_8 = arith.constant 0 : index
    %19 = vector.load %arg5[%c0_7, %c0_8] : memref<32x1xf32, #tpu.memory_space<vmem>>, vector<32x1xf32>
    %20 = vector.broadcast %19 : vector<32x1xf32> to vector<32x128xf32>
    %21 = arith.addf %18, %20 : vector<32x128xf32>
    %cst = arith.constant 0.000000e+00 : f32
    %22 = vector.broadcast %cst : f32 to vector<32x128xf32>
    %23 = arith.maximumf %21, %22 : vector<32x128xf32>
    %c0_9 = arith.constant 0 : index
    %c0_10 = arith.constant 0 : index
    %24 = vector.load %arg6[%c0_9, %c0_10] : memref<32x32xf32, #tpu.memory_space<vmem>>, vector<32x32xf32>
    %cst_11 = arith.constant dense<0.000000e+00> : vector<32x128xf32>
    %25 = tpu.matmul %24, %23, %cst_11 {dimension_numbers = #tpu.dot_dimension_numbers<[1], [0], [0], [1], [0, 0, 1, 1], [], []>} : vector<32x32xf32>, vector<32x128xf32>, vector<32x128xf32> -> vector<32x128xf32>
    %c0_12 = arith.constant 0 : index
    %c0_13 = arith.constant 0 : index
    %26 = vector.load %arg7[%c0_12, %c0_13] : memref<32x1xf32, #tpu.memory_space<vmem>>, vector<32x1xf32>
    %27 = vector.broadcast %26 : vector<32x1xf32> to vector<32x128xf32>
    %28 = arith.addf %25, %27 : vector<32x128xf32>
    %cst_14 = arith.constant 0.000000e+00 : f32
    %29 = vector.broadcast %cst_14 : f32 to vector<32x128xf32>
    %30 = arith.maximumf %28, %29 : vector<32x128xf32>
    %c0_15 = arith.constant 0 : index
    %c0_16 = arith.constant 0 : index
    %31 = vector.load %arg8[%c0_15, %c0_16] : memref<1x32xf32, #tpu.memory_space<vmem>>, vector<1x32xf32>
    %cst_17 = arith.constant dense<0.000000e+00> : vector<1x128xf32>
    %32 = tpu.matmul %31, %30, %cst_17 {dimension_numbers = #tpu.dot_dimension_numbers<[1], [0], [0], [1], [0, 0, 1, 1], [], []>} : vector<1x32xf32>, vector<32x128xf32>, vector<1x128xf32> -> vector<1x128xf32>
    %c0_18 = arith.constant 0 : index
    %c0_19 = arith.constant 0 : index
    %33 = vector.load %arg9[%c0_18, %c0_19] : memref<1x1xf32, #tpu.memory_space<vmem>>, vector<1x1xf32>
    %34 = vector.broadcast %33 : vector<1x1xf32> to vector<1x128xf32>
    %35 = arith.addf %32, %34 : vector<1x128xf32>
    %c0_20 = arith.constant 0 : index
    %c0_21 = arith.constant 0 : index
    %36 = vector.load %arg10[%c0_20, %c0_21] : memref<1x128xf32, #tpu.memory_space<vmem>>, vector<1x128xf32>
    tpu.vector_store %arg10[%c0_20, %c0_21], %35 {strides = array<i32>} : memref<1x128xf32, #tpu.memory_space<vmem>>, vector<1x128xf32>,
    return
  }
  func.func @transform_0(%arg0: i32) -> (i32, i32) {
    %c0_i32 = arith.constant 0 : i32
    %c0_i32_0 = arith.constant 0 : i32
    return %c0_i32, %arg0 : i32, i32
  }
  func.func @transform_1(%arg0: i32) -> (i32, i32) {
    %c0_i32 = arith.constant 0 : i32
    %c0_i32_0 = arith.constant 0 : i32
    return %c0_i32, %arg0 : i32, i32
  }
  func.func @transform_2(%arg0: i32) -> (i32, i32) {
    %c0_i32 = arith.constant 0 : i32
    %c0_i32_0 = arith.constant 0 : i32
    %c0_i32_1 = arith.constant 0 : i32
    return %c0_i32, %c0_i32_0 : i32, i32
  }
  func.func @transform_3(%arg0: i32) -> (i32, i32) {
    %c0_i32 = arith.constant 0 : i32
    %c0_i32_0 = arith.constant 0 : i32
    %c0_i32_1 = arith.constant 0 : i32
    return %c0_i32, %c0_i32_0 : i32, i32
  }
  func.func @transform_4(%arg0: i32) -> (i32, i32) {
    %c0_i32 = arith.constant 0 : i32
    %c0_i32_0 = arith.constant 0 : i32
    %c0_i32_1 = arith.constant 0 : i32
    return %c0_i32, %c0_i32_0 : i32, i32
  }
  func.func @transform_5(%arg0: i32) -> (i32, i32) {
    %c0_i32 = arith.constant 0 : i32
    %c0_i32_0 = arith.constant 0 : i32
    %c0_i32_1 = arith.constant 0 : i32
    return %c0_i32, %c0_i32_0 : i32, i32
  }
  func.func @transform_6(%arg0: i32) -> (i32, i32) {
    %c0_i32 = arith.constant 0 : i32
    %c0_i32_0 = arith.constant 0 : i32
    %c0_i32_1 = arith.constant 0 : i32
    return %c0_i32, %c0_i32_0 : i32, i32
  }
  func.func @transform_7(%arg0: i32) -> (i32, i32) {
    %c0_i32 = arith.constant 0 : i32
    %c0_i32_0 = arith.constant 0 : i32
    %c0_i32_1 = arith.constant 0 : i32
    return %c0_i32, %c0_i32_0 : i32, i32
  }
  func.func @transform_8(%arg0: i32) -> (i32, i32) {
    %c0_i32 = arith.constant 0 : i32
    %c0_i32_0 = arith.constant 0 : i32
    %c0_i32_1 = arith.constant 0 : i32
    return %c0_i32, %c0_i32_0 : i32, i32
  }
  func.func @transform_9(%arg0: i32) -> (i32, i32) {
    %c0_i32 = arith.constant 0 : i32
    %c0_i32_0 = arith.constant 0 : i32
    return %c0_i32, %arg0 : i32, i32
  }
}

</mosaic_0001>

<bundles_post_ra>
// kernel: tpu_custom_call.1
= control target key start
LH: loop header
LB: loop body
LE: loop exit
PB: predicated region body
PF: predicated region fallthrough
CT: control target
= control target key end

     0   :  { %s643_s0 = inlined_call_operand.vmem [shape: f32[2,128], index: 0, kind: input, shape index: {}]   ;;  %s644_s1 = inlined_call_operand.vmem [shape: f32[1,128], index: 1, kind: input, shape index: {}]   ;;  %s645_s2 = inlined_call_operand.vmem [shape: f32[32,2], index: 2, kind: input, shape index: {}]   ;;  %s646_s3 = inlined_call_operand.vmem [shape: f32[32,1], index: 3, kind: input, shape index: {}]   ;;  %s647_s4 = inlined_call_operand.vmem [shape: f32[32,1], index: 4, kind: input, shape index: {}]   ;;  %s648_s5 = inlined_call_operand.vmem [shape: f32[32,32], index: 5, kind: input, shape index: {}]   ;;  %s649_s6 = inlined_call_operand.vmem [shape: f32[32,1], index: 6, kind: input, shape index: {}]   ;;  %s650_s7 = inlined_call_operand.vmem [shape: f32[1,32], index: 7, kind: input, shape index: {}]   ;;  %s651_s8 = inlined_call_operand.<no memory space> [shape: f32[1,1], index: 8, kind: input, shape index: {}]   ;;  %s652_s9 = inlined_call_operand.hbm [shape: f32[1,128], index: 9, kind: output, shape index: {}]  }
   0x1   :  { %v14_v0 = vstv %s651_s8 }
   0x2   :  { %15 = vst [vmem:[#allocation2] sm:$0x1] %v14_v0 }
   0x3   :  { %v39_v1 = vld [vmem:[%s645_s2 + $0x10] sm:$0xff]  ;;  %v37_v2 = vld [vmem:[%s645_s2] sm:$0xff]  ;;  %v490_v3 = vmov 1   ;;  %v38_v4 = vld [vmem:[%s645_s2 + $0x8] sm:$0xff]  ;;  %v491_v5 = vmov 0  }
   0x4   :  { %462 = vset.pattern.permute.xlu0 %v490_v3  ;;  %460 = vset.pattern.permute.xlu1 %v490_v3 }
   0x5   :  { %82 = vperm.xlu0 %462, %v39_v1   ;;  %74 = vperm.xlu1 %460, %v37_v2  }
   0x9   :  { %463 = vset.pattern.permute.xlu0 %v491_v5  ;;  %78 = vperm.xlu1 %460, %v38_v4  }
   0xa   :  { %16 = vsyncpa [#allocation4], 0  ;;  %47 = vperm.xlu0 %463, %v37_v2   ;;  %v42_v6 = vld [vmem:[%s646_s3 + $0x8] sm:$0xff]  ;;  %v41_v7 = vld [vmem:[%s646_s3] sm:$0xff]  ;;  %vm195_vm0 = vcmask 261120   ;;  %v65_v25 = vlaneseq  ;;  %vm493_vm1 = vmmov 0  }
   0xb   :  { %v40_v8 = vld [vmem:[%s645_s2 + $0x18] sm:$0xff]  ;;  %v43_v10 = vld [vmem:[%s646_s3 + $0x10] sm:$0xff]  ;;  %v135_v12 = vld [vmem:[%s647_s4] sm:$0xff]  ;;  %s495_s27 = smov [#allocation3]  }
   0xc   :  { %v44_v9 = vld [vmem:[%s646_s3 + $0x18] sm:$0xff]  ;;  %v137_v11 = vld [vmem:[%s647_s4 + $0x10] sm:$0xff]  ;;  %v171_v13 = vld [vmem:[%s649_s6] sm:$0xff]  ;;  %v601_v28 = vshrl.u32 %v65_v25, 7  ;;  %s388_s2 = sshll.u32 %s495_s27, 4  ;;  %s389_s2 = int_to_ptr.vmem [resolvable:$true] %s388_s2 }
   0xd   :  { %461 = vset.pattern.permute.xlu1 %v491_v5  ;;  %v136_v14 = vld [vmem:[%s647_s4 + $0x8] sm:$0xff]  ;;  %v173_v15 = vld [vmem:[%s649_s6 + $0x10] sm:$0xff]  ;;  %v138_v16 = vld [vmem:[%s647_s4 + $0x18] sm:$0xff]  ;;  %s466_s28 = scalar_lea.vmem %s389_s2, 16  ;;  %s470_s29 = scalar_lea.vmem %s389_s2, 32 }
   0xe   :  { %52 = vperm.xlu0 %463, %v38_v4   ;;  %108 = vperm.xlu1 %461, %v42_v6   ;;  %v298_v17 = vld [vmem:[#allocation2] sm:$0x1]  ;;  %v172_v18 = vld [vmem:[%s649_s6 + $0x8] sm:$0xff]  ;;  %v174_v19 = vld [vmem:[%s649_s6 + $0x18] sm:$0xff]  ;;  %v67_v30 = vsub.s32 0, %v601_v28  ;;  %v91_v32 = vsub.s32 1, %v601_v28  ;;  %p467_p0 = scmp.ne.s32.totalorder %s389_s2, %s466_s28  ;;  %p471_p1 = scmp.lt.s32.totalorder %s389_s2, %s389_s2 }
   0xf   :  { %v167_v20 = vld [vmem:[%s648_s5] sm:$0xff]  ;;  %p472_p2 = scmp.lt.s32.totalorder %s470_s29, %s466_s28 }
  0x10   :  { %423 = vmatprep.mubr.msk.f32.mxu0 %vm195_vm0, %v167_v20  ;;  %v35_v33 = vld [vmem:[%s643_s0] sm:$0x3] }
  0x11   :  { %v68_v34 = vrot.slane %v35_v33, %v67_v30  ;;  %v92_v36 = vrot.slane %v35_v33, %v91_v32  ;;  %v396_v41 = vld [vmem:[%s644_s1] ss:$0 sm:$0xff]  ;;  %p473_p3 = por %p472_p2, %p471_p1 }
  0x12   :  { %103 = vperm.xlu0 %463, %v41_v7   ;;  %62 = vperm.xlu1 %461, %v40_v8  }
  0x13   :  { %p474_p4 = pnand %p473_p3, %p467_p0 }
  0x16   :  { %57 = vperm.xlu0 %463, %v39_v1   ;;  %464 = vset.pattern.permute.xlu1 %v490_v3 }
  0x17   :  { %86 = vperm.xlu1 %464, %v40_v8  }
  0x1a   :  { %118 = vperm.xlu0 %463, %v44_v9  }
  0x1b   :  { %465 = vset.pattern.permute.xlu1 %v491_v5 }
  0x1c   :  { %113 = vperm.xlu1 %465, %v43_v10  }
  0x1e   :  { %151 = vperm.xlu0 %463, %v137_v11   ;;  %v168_v11 = vld [vmem:[%s648_s5 + $0x8] sm:$0xff] }
  0x20   :  { %141 = vperm.xlu1 %465, %v135_v12   ;;  %v169_v12 = vld [vmem:[%s648_s5 + $0x10] sm:$0xff] }
  0x22   :  { %177 = vperm.xlu0 %463, %v171_v13   ;;  %v170_v13 = vld [vmem:[%s648_s5 + $0x18] sm:$0xff] }
  0x24   :  { %146 = vperm.xlu1 %465, %v136_v14   ;;  %v492_v14 = vmov 0.0|0.0  }
  0x25   :  { %448 = vmatprep.subr.bf16.mxu1 %v492_v14 }
  0x26   :  { %187 = vperm.xlu0 %463, %v173_v15   ;;  %v494_v15 = vmov 0.0  }
  0x27   :  { %437 = vmatprep.mubr.msk.f32.mxu1 %vm493_vm1, %v494_v15 }
  0x28   :  { %156 = vperm.xlu1 %465, %v138_v16  }
  0x2a   :  { %301 = vperm.xlu0 %463, %v298_v17  }
  0x2c   :  { %182 = vperm.xlu1 %465, %v172_v18  }
  0x30   :  { %192 = vperm.xlu1 %465, %v174_v19  }
  0x84   :  { %v75_v21 = vpop.permute.xlu1 %74  ;;  %v83_v22 = vpop.permute.xlu0 %82 }
  0x85   :  { %v93_v43 = vmul.f32 %v92_v36, %v75_v21  ;;  %v95_v47 = vmul.f32 %v92_v36, %v83_v22 }
  0x88   :  { %v79_v23 = vpop.permute.xlu1 %78 }
  0x89   :  { %v48_v24 = vpop.permute.xlu0 %47  ;;  %v94_v40 = vmul.f32 %v92_v36, %v79_v23 }
  0x8a   :  { %v69_v39 = vmul.f32 %v68_v34, %v48_v24 }
  0x8c   :  { %v97_v48 = vadd.f32 %v93_v43, %v69_v39 }
  0x8d   :  { %v53_v26 = vpop.permute.xlu0 %52  ;;  %v109_v27 = vpop.permute.xlu1 %108 }
  0x8e   :  { %v70_v37 = vmul.f32 %v68_v34, %v53_v26  ;;  %v128_v51 = vmul.f32 %v396_v41, %v109_v27 }
  0x90   :  { %v98_v46 = vadd.f32 %v94_v40, %v70_v37 }
  0x91   :  { %v63_v29 = vpop.permute.xlu1 %62  ;;  %v104_v31 = vpop.permute.xlu0 %103 }
  0x92   :  { %v127_v44 = vmul.f32 %v396_v41, %v104_v31  ;;  %v72_v54 = vmul.f32 %v68_v34, %v63_v29  ;;  %v132_v57 = vadd.f32 %v128_v51, %v98_v46 }
  0x94   :  { %v131_v56 = vadd.f32 %v127_v44, %v97_v48 }
  0x95   :  { %v58_v38 = vpop.permute.xlu0 %57 }
  0x96   :  { %v87_v35 = vpop.permute.xlu1 %86  ;;  %v71_v45 = vmul.f32 %v68_v34, %v58_v38 }
  0x97   :  { %v96_v49 = vmul.f32 %v92_v36, %v87_v35  ;;  %v297_v36 = vld [vmem:[%s650_s7] sm:$0x1] }
  0x98   :  { %v99_v55 = vadd.f32 %v95_v47, %v71_v45 }
  0x99   :  { %v119_v52 = vpop.permute.xlu0 %118  ;;  %v100_v58 = vadd.f32 %v96_v49, %v72_v54 }
  0x9a   :  { %v130_v59 = vmul.f32 %v396_v41, %v119_v52 }
  0x9b   :  { %v114_v42 = vpop.permute.xlu1 %113 }
  0x9c   :  { %v129_v50 = vmul.f32 %v396_v41, %v114_v42  ;;  %v134_v4 = vadd.f32 %v130_v59, %v100_v58 }
  0x9d   :  { %v152_v0 = vpop.permute.xlu0 %151 }
  0x9e   :  { %v133_v60 = vadd.f32 %v129_v50, %v99_v55 }
  0x9f   :  { %v142_v53 = vpop.permute.xlu1 %141 }
  0xa0   :  { %v159_v61 = vadd.f32 %v142_v53, %v131_v56  ;;  %v161_v1 = vadd.f32 %v152_v0, %v133_v60 }
  0xa1   :  { %v178_v17 = vpop.permute.xlu0 %177 }
  0xa2   :  { %v163_v2 = vmax.f32 %v159_v61, 0.0  ;;  %v165_v8 = vmax.f32 %v161_v1, 0.0 }
  0xa3   :  { %v147_v62 = vpop.permute.xlu1 %146 }
  0xa4   :  { %v160_v63 = vadd.f32 %v147_v62, %v132_v57 }
  0xa5   :  { %v188_v26 = vpop.permute.xlu0 %187 }
  0xa6   :  { %v164_v3 = vmax.f32 %v160_v63, 0.0 }
  0xa7   :  { %v157_v5 = vpop.permute.xlu1 %156 }
  0xa8   :  { %v162_v6 = vadd.f32 %v157_v5, %v134_v4  ;;  %v440_v7 = vpack.c.bf16 %v164_v3, %v163_v2 }
  0xa9   :  { %v302_v37 = vpop.permute.xlu0 %301 }
  0xaa   :  { %v166_v9 = vmax.f32 %v162_v6, 0.0  ;;  %441 = vmatprep.subr.bf16.mxu0 %v440_v7  ;;  %v307_v38 = vrot.slane %v302_v37, %v67_v30 }
  0xab   :  { %443 = vmatpush3.bf16.msra.mxu0 %v440_v7  ;;  %v183_v16 = vpop.permute.xlu1 %182 }
  0xac   :  { %v444_v10 = vpack.c.bf16 %v166_v9, %v165_v8 }
  0xae   :  { %445 = vmatprep.subr.bf16.mxu0 %v444_v10 }
  0xaf   :  { %447 = vmatpush3.bf16.msra.mxu0 %v444_v10  ;;  %v193_v23 = vpop.permute.xlu1 %192 }
  0xb2   :  { %424 = vmatmul.mubr.msk.f32.vlgmr.msra.gmra.mrb[0].mxu0 %vm195_vm0, %v168_v11 }
  0xb3   :  { %426 = vmatprep.mubr.msk.f32.mxu0 %vm195_vm0, %v169_v12 }
  0xb6   :  { %427 = vmatmul.mubr.msk.f32.gmra.mrb[2].mxu0 %vm195_vm0, %v170_v13 }
 0x185   :  { %v425_v18 = vpop.f32.mrb[0].mxu0 }
 0x186   :  { %v280_v19 = vadd.f32 %v425_v18, %v183_v16  ;;  %v274_v20 = vpop.f32.mrb[1].mxu0 }
 0x187   :  { %v275_v21 = vadd.f32 %v274_v20, %v178_v17 }
 0x188   :  { %v294_v22 = vmax.f32 %v280_v19, 0.0 }
 0x189   :  { %v293_v24 = vmax.f32 %v275_v21, 0.0  ;;  %v428_v25 = vpop.f32.mrb[2].mxu0 }
 0x18a   :  { %v290_v27 = vadd.f32 %v428_v25, %v193_v23  ;;  %v284_v29 = vpop.f32.mrb[3].mxu0 }
 0x18b   :  { %v285_v31 = vadd.f32 %v284_v29, %v188_v26  ;;  %v449_v32 = vpack.c.bf16 %v294_v22, %v293_v24 }
 0x18c   :  { %v296_v33 = vmax.f32 %v290_v27, 0.0 }
 0x18d   :  { %v295_v34 = vmax.f32 %v285_v31, 0.0  ;;  %450 = vmatpush3.bf16.msra.mxu1 %v449_v32 }
 0x18e   :  { %451 = vmatprep.subr.bf16.mxu1 %v492_v14 }
 0x18f   :  { %v452_v35 = vpack.c.bf16 %v296_v33, %v295_v34 }
 0x191   :  { %453 = vmatpush3.bf16.msra.mxu1 %v452_v35 }
 0x194   :  { %438 = vmatmul.mubr.msk.f32.vlgmr.msra.gmra.mrb[0].mxu1 %vm195_vm0, %v297_v36 }
 0x267   :  { %v377_v39 = vpop.f32.mrb[0].mxu1 }
 0x268   :  { %v378_v40 = vadd.f32 %v377_v39, %v307_v38  ;;  %v439_v41 = vpop.f32.mrb[1].mxu1 }
 0x26a   :  { %381 = vst [vmem:[#allocation3] sm:$0x1] %v378_v40 }
 0x26b   :  { %477 = shalt.err (!%p474_p4)
}
 0x26c   :  { %s478_s10 = scalar_lea.hbm %s652_s9, 16 }
 0x26d   :  { %p479_p5 = scmp.ne.s32.totalorder %s652_s9, %s478_s10  ;;  %p482_p6 = scmp.lt.u32.totalorder %s478_s10, %s652_s9 }
 0x26f   :  { %p484_p7 = pnand %p482_p6, %p479_p5 }
 0x271   :  { %487 = shalt.err (!%p484_p7)
}
 0x272   :  { %391 = dma.vmem_to_hbm [thread:$0]  %s389_s2, 16, %s652_s9, [#allocation4]  }
 0x273   :  { %488 = dma.done.wait [#allocation4], 16  }
 0x274   :  { %489 = vsyncadd [#allocation4], 4294967280 }
 0x275   :  { %395 = vsyncpa [#allocation4], 1 }

</bundles_post_ra>
